<compile_context>
chip_gen: v5e
topology: v5e:2x2
jax: 0.10.0
libtpu: 0.0.40
codegen_flags: <defaults>
</compile_context>

<pallas_src>
import functools

import jax
import jax.numpy as jnp
from jax.experimental import pallas as pl
from jax.experimental.pallas import tpu as pltpu


def _se_kernel_chw(x_ref, w1t_ref, w2_ref, o_ref, *, inv_hw):
    """Layout A: x/o blocks are (BB, C, HW) — HW on lanes."""
    x = x_ref[...]                                                   # (BB, C, HW)
    # Squeeze: mean over the spatial (lane) axis, accumulated in f32.
    pooled = jnp.sum(x.astype(jnp.float32), axis=-1, keepdims=True) * inv_hw  # (BB, C, 1)
    # Excitation: tiny FCs done as VPU broadcast-multiply + cross-sublane/lane
    # reductions (negligible FLOPs; MXU stays idle on purpose).
    h = jnp.maximum(
        jnp.sum(pooled * w1t_ref[...][None, :, :], axis=1), 0.0)     # (BB, Cr)
    s = jax.nn.sigmoid(
        jnp.sum(h[:, None, :] * w2_ref[...][None, :, :], axis=-1))   # (BB, C)
    gate = s[:, :, None].astype(x.dtype)                             # (BB, C, 1)
    # Scale: lane-dense, full-block store in the native activation dtype.
    o_ref[...] = (x * gate).astype(o_ref.dtype)


def _se_kernel_hwc(x_ref, w1_ref, w2_ref, o_ref, *, inv_hw):
    """Layout B (channels-last): x/o blocks are (BB, HW, C) — C on lanes."""
    x = x_ref[...]                                                   # (BB, HW, C)
    pooled = jnp.sum(x.astype(jnp.float32), axis=1, keepdims=True) * inv_hw   # (BB, 1, C)
    h = jnp.maximum(
        jnp.sum(pooled * w1_ref[...][None, :, :], axis=-1), 0.0)     # (BB, Cr)
    s = jax.nn.sigmoid(
        jnp.sum(h[:, None, :] * w2_ref[...][None, :, :], axis=-1))   # (BB, C)
    gate = s[:, None, :].astype(x.dtype)                             # (BB, 1, C)
    o_ref[...] = (x * gate).astype(o_ref.dtype)


def se_block(x, w1, w2):
    """SE block forward.

    x:  (B, C, H, W) (NCHW, PyTorch layout)
    w1: (Cr, C) -- first nn.Linear weight (out, in), bias-free
    w2: (C, Cr) -- second nn.Linear weight (out, in), bias-free
    """
    B, C, H, W = x.shape
    HW = H * W
    Cr = w1.shape[0]
    dtype = x.dtype
    itemsize = jnp.dtype(dtype).itemsize

    # ---- Lane-axis choice: last dim should be a multiple of 128 when possible.
    channels_last = (HW % 128 != 0) and (C % 128 == 0)
    if channels_last:
        x_in = jnp.transpose(x.reshape(B, C, HW), (0, 2, 1))          # (B, HW, C)
        w1_in = jnp.asarray(w1)                                        # (Cr, C)
        kernel = functools.partial(_se_kernel_hwc, inv_hw=1.0 / float(HW))
        inner_shape = (HW, C)
    else:
        x_in = x.reshape(B, C, HW)                                     # (B, C, HW)
        w1_in = jnp.transpose(w1)                                      # (C, Cr)
        kernel = functools.partial(_se_kernel_chw, inv_hw=1.0 / float(HW))
        inner_shape = (C, HW)
    w2_in = jnp.asarray(w2)                                            # (C, Cr)

    # ---- Batch blocking: ~2 MiB per x block, but keep >= ~4 grid steps when B allows
    # (>= 2 steps per TensorCore on v7x so double-buffering still overlaps).
    per_image_bytes = C * HW * itemsize
    target_block_bytes = 2 << 20
    bb = max(1, min(B, target_block_bytes // per_image_bytes))
    if B >= 4:
        bb = min(bb, max(1, B // 4))

    # ---- Generation-aware VMEM budget (v7x has 64 MiB/TC vs 128 MiB on v5e/v6e).
    try:
        vmem_cap = int(pltpu.get_tpu_info().vmem_capacity_bytes)
    except Exception:
        vmem_cap = 64 << 20  # conservative: smallest per-TC VMEM (v7x)
    vmem_budget = int(vmem_cap * 0.6)

    weight_bytes = 2 * (C * Cr * 4) * 2  # two weights, double-buffered

    def vmem_needed(bb_, n_in_buf):
        return (n_in_buf + 2) * bb_ * per_image_bytes + weight_bytes + (2 << 20)

    while bb > 1 and vmem_needed(bb, 2) > vmem_budget:
        bb = max(1, bb // 2)
    grid_b = pl.cdiv(B, bb)

    extra_buffering = (
        grid_b >= 8 and hasattr(pl, "Buffered") and vmem_needed(bb, 3) <= vmem_budget
    )
    needed = vmem_needed(bb, 3 if extra_buffering else 2)
    vmem_limit = int(min(max(needed, 16 << 20), max(16 << 20, int(vmem_cap * 0.9))))

    # ---- BlockSpecs.
    block_x = (bb,) + inner_shape
    x_spec_kwargs = {}
    if extra_buffering:
        x_spec_kwargs["pipeline_mode"] = pl.Buffered(3)
    in_specs = [
        pl.BlockSpec(block_x, lambda b: (b, 0, 0), **x_spec_kwargs),
        pl.BlockSpec(w1_in.shape, lambda b: (0, 0)),
        pl.BlockSpec(w2_in.shape, lambda b: (0, 0)),
    ]
    out_specs = pl.BlockSpec(block_x, lambda b: (b, 0, 0))

    out = pl.pallas_call(
        kernel,
        out_shape=jax.ShapeDtypeStruct(x_in.shape, dtype),
        grid=(grid_b,),
        in_specs=in_specs,
        out_specs=out_specs,
        # In-place over the (reshaped) input: same shape/dtype, disjoint blocks.
        input_output_aliases={0: 0},
        compiler_params=pltpu.CompilerParams(
            dimension_semantics=("parallel",),
            vmem_limit_bytes=vmem_limit,
        ),
    )(x_in, w1_in, w2_in)

    if channels_last:
        return jnp.transpose(out, (0, 2, 1)).reshape(B, C, H, W)
    return out.reshape(B, C, H, W)


def se_block_reference(x, w1, w2):
    """Pure-JAX reference matching the PyTorch forward."""
    y = jnp.mean(x, axis=(2, 3))                 # (B, C)
    h = jnp.maximum(y @ w1.T, 0.0)               # (B, Cr)
    s = jax.nn.sigmoid(h @ w2.T)                 # (B, C)
    return x * s[:, :, None, None]


if __name__ == "__main__":
    # Small shapes consistent with the module (in_channels divisible by reduction=16).
    B, C, H, W = 2, 32, 16, 16
    reduction = 16
    Cr = C // reduction  # = 2

    key = jax.random.PRNGKey(0)
    kx, kw1, kw2 = jax.random.split(key, 3)

    x = jax.random.normal(kx, (B, C, H, W), dtype=jnp.float32)
    # PyTorch nn.Linear weight layout: (out_features, in_features), no bias.
    w1 = jax.random.normal(kw1, (Cr, C), dtype=jnp.float32) * (1.0 / jnp.sqrt(C))
    w2 = jax.random.normal(kw2, (C, Cr), dtype=jnp.float32) * (1.0 / jnp.sqrt(Cr))

    ref = se_block_reference(x, w1, w2)

    se_fn = jax.jit(se_block)
    out = jax.block_until_ready(se_fn(x, w1, w2))

    assert out.shape == (B, C, H, W)
    assert jnp.allclose(out, ref, atol=1e-5, rtol=1e-5), "mismatch vs reference"

    print("KERNEL_OK")
</pallas_src>

<mosaic_0001>
module attributes {stable_mosaic.version = 11 : i64} {
  func.func @_se_kernel_chw(%arg0: i32, %arg1: memref<2x32x256xf32, #tpu.memory_space<vmem>>, %arg2: memref<32x2xf32, #tpu.memory_space<vmem>>, %arg3: memref<32x2xf32, #tpu.memory_space<vmem>>, %arg4: memref<2x32x256xf32, #tpu.memory_space<vmem>>) attributes {dimension_semantics = [#tpu.dimension_semantics<parallel>], iteration_bounds = array<i64: 1>, scalar_prefetch = 0 : i64, scratch_operands = 0 : i64, tpu.core_type = #tpu.core_type<tc>, window_params = [{transform_indices = @transform_0, window_bounds = array<i64: 2, 32, 256>}, {pipeline_mode = #tpu.pipeline_mode<synchronous>, transform_indices = @transform_1, window_bounds = array<i64: 32, 2>}, {pipeline_mode = #tpu.pipeline_mode<synchronous>, transform_indices = @transform_2, window_bounds = array<i64: 32, 2>}, {transform_indices = @transform_3, window_bounds = array<i64: 2, 32, 256>}]} {
    %c0 = arith.constant 0 : index
    %c0_0 = arith.constant 0 : index
    %c0_1 = arith.constant 0 : index
    %0 = vector.load %arg1[%c0, %c0_0, %c0_1] : memref<2x32x256xf32, #tpu.memory_space<vmem>>, vector<2x32x256xf32>
    %cst = arith.constant dense<0.000000e+00> : vector<2x32xf32>
    %1 = vector.multi_reduction <add>, %0, %cst [2] : vector<2x32x256xf32> to vector<2x32xf32>
    %2 = vector.shape_cast %1 : vector<2x32xf32> to vector<2x32x1xf32>
    %cst_2 = arith.constant 3.906250e-03 : f32
    %3 = vector.broadcast %cst_2 : f32 to vector<2x32x1xf32>
    %4 = arith.mulf %2, %3 : vector<2x32x1xf32>
    %c0_3 = arith.constant 0 : index
    %c0_4 = arith.constant 0 : index
    %5 = vector.load %arg2[%c0_3, %c0_4] : memref<32x2xf32, #tpu.memory_space<vmem>>, vector<32x2xf32>
    %6 = vector.shape_cast %5 : vector<32x2xf32> to vector<1x32x2xf32>
    %7 = vector.broadcast %4 : vector<2x32x1xf32> to vector<2x32x2xf32>
    %8 = vector.broadcast %6 : vector<1x32x2xf32> to vector<2x32x2xf32>
    %9 = arith.mulf %7, %8 : vector<2x32x2xf32>
    %cst_5 = arith.constant dense<0.000000e+00> : vector<2x2xf32>
    %10 = vector.multi_reduction <add>, %9, %cst_5 [1] : vector<2x32x2xf32> to vector<2x2xf32>
    %cst_6 = arith.constant 0.000000e+00 : f32
    %11 = vector.broadcast %cst_6 : f32 to vector<2x2xf32>
    %12 = arith.maximumf %10, %11 : vector<2x2xf32>
    %13 = vector.shape_cast %12 : vector<2x2xf32> to vector<2x1x2xf32>
    %c0_7 = arith.constant 0 : index
    %c0_8 = arith.constant 0 : index
    %14 = vector.load %arg3[%c0_7, %c0_8] : memref<32x2xf32, #tpu.memory_space<vmem>>, vector<32x2xf32>
    %15 = vector.shape_cast %14 : vector<32x2xf32> to vector<1x32x2xf32>
    %16 = vector.broadcast %13 : vector<2x1x2xf32> to vector<2x32x2xf32>
    %17 = vector.broadcast %15 : vector<1x32x2xf32> to vector<2x32x2xf32>
    %18 = arith.mulf %16, %17 : vector<2x32x2xf32>
    %cst_9 = arith.constant dense<0.000000e+00> : vector<2x32xf32>
    %19 = vector.multi_reduction <add>, %18, %cst_9 [2] : vector<2x32x2xf32> to vector<2x32xf32>
    %20 = arith.negf %19 : vector<2x32xf32>
    %21 = math.exp %20 : vector<2x32xf32>
    %cst_10 = arith.constant 1.000000e+00 : f32
    %22 = vector.broadcast %cst_10 : f32 to vector<2x32xf32>
    %23 = arith.addf %22, %21 : vector<2x32xf32>
    %24 = arith.divf %22, %23 : vector<2x32xf32>
    %25 = vector.shape_cast %24 : vector<2x32xf32> to vector<2x32x1xf32>
    %26 = vector.broadcast %25 : vector<2x32x1xf32> to vector<2x32x256xf32>
    %27 = arith.mulf %0, %26 : vector<2x32x256xf32>
    %c0_11 = arith.constant 0 : index
    %c0_12 = arith.constant 0 : index
    %c0_13 = arith.constant 0 : index
    %28 = vector.load %arg4[%c0_11, %c0_12, %c0_13] : memref<2x32x256xf32, #tpu.memory_space<vmem>>, vector<2x32x256xf32>
    tpu.vector_store %arg4[%c0_11, %c0_12, %c0_13], %27 {strides = array<i32>} : memref<2x32x256xf32, #tpu.memory_space<vmem>>, vector<2x32x256xf32>,
    return
  }
  func.func @transform_0(%arg0: i32) -> (i32, i32, i32) {
    %c0_i32 = arith.constant 0 : i32
    %c0_i32_0 = arith.constant 0 : i32
    %c0_i32_1 = arith.constant 0 : i32
    return %arg0, %c0_i32, %c0_i32_0 : i32, i32, i32
  }
  func.func @transform_1(%arg0: i32) -> (i32, i32) {
    %c0_i32 = arith.constant 0 : i32
    %c0_i32_0 = arith.constant 0 : i32
    %c0_i32_1 = arith.constant 0 : i32
    return %c0_i32, %c0_i32_0 : i32, i32
  }
  func.func @transform_2(%arg0: i32) -> (i32, i32) {
    %c0_i32 = arith.constant 0 : i32
    %c0_i32_0 = arith.constant 0 : i32
    %c0_i32_1 = arith.constant 0 : i32
    return %c0_i32, %c0_i32_0 : i32, i32
  }
  func.func @transform_3(%arg0: i32) -> (i32, i32, i32) {
    %c0_i32 = arith.constant 0 : i32
    %c0_i32_0 = arith.constant 0 : i32
    %c0_i32_1 = arith.constant 0 : i32
    return %arg0, %c0_i32, %c0_i32_0 : i32, i32, i32
  }
}

</mosaic_0001>

<bundles_post_ra>
// kernel: se_block.1
= control target key start
LH: loop header
LB: loop body
LE: loop exit
PB: predicated region body
PF: predicated region fallthrough
CT: control target
= control target key end

     0   :  { %vm74_vm0 = vcmask 15360   ;;  %s663_s0 = inlined_call_operand.vmem [shape: f32[2,32,256], index: 0, kind: input, shape index: {}, may-alias: {0,3}]   ;;  %s664_s1 = inlined_call_operand.vmem [shape: f32[32,2], index: 1, kind: input, shape index: {}]   ;;  %s665_s2 = inlined_call_operand.vmem [shape: f32[32,2], index: 2, kind: input, shape index: {}]   ;;  %s666_s3 = inlined_call_operand.vmem [shape: f32[2,32,256], index: 3, kind: output, shape index: {}, may-alias: {0,3}]  }
   0x1   :  { %v390_v0 = vld [vmem:[%s663_s0 + $0x40] sm:$0xff]  ;;  %v395_v1 = vld [vmem:[%s663_s0 + $0x48] sm:$0xff]  ;;  %v426_v9 = vld [vmem:[%s663_s0 + $0x50] sm:$0xff] }
   0x2   :  { %v400_v2 = vld [vmem:[%s663_s0] sm:$0xff]  ;;  %v42_v3 = vadd.f32 %v395_v1, %v390_v0  ;;  %v407_v4 = vld [vmem:[%s663_s0 + $0x8] sm:$0xff]  ;;  %v431_v10 = vld [vmem:[%s663_s0 + $0x58] sm:$0xff] }
   0x3   :  { %v412_v5 = vld [vmem:[%s663_s0 + $0x20] sm:$0xff]  ;;  %v417_v6 = vld [vmem:[%s663_s0 + $0x28] sm:$0xff]  ;;  %v30_v7 = vadd.f32 %v407_v4, %v400_v2  ;;  %v436_v11 = vld [vmem:[%s663_s0 + $0x10] sm:$0xff]  ;;  %v45_v15 = vadd.f32 %v431_v10, %v426_v9 }
   0x4   :  { %v36_v8 = vadd.f32 %v417_v6, %v412_v5  ;;  %43 = vadd.xlane.f32.xlu1 %v42_v3  ;;  %v441_v12 = vld [vmem:[%s663_s0 + $0x18] sm:$0xff]  ;;  %v446_v13 = vld [vmem:[%s663_s0 + $0x60] sm:$0xff]  ;;  %v451_v14 = vld [vmem:[%s663_s0 + $0x68] sm:$0xff] }
   0x5   :  { %31 = vadd.xlane.f32.xlu0 %v30_v7  ;;  %v33_v16 = vadd.f32 %v441_v12, %v436_v11  ;;  %v48_v17 = vadd.f32 %v451_v14, %v446_v13  ;;  %v462_v18 = vld [vmem:[%s663_s0 + $0x70] sm:$0xff]  ;;  %v467_v19 = vld [vmem:[%s663_s0 + $0x78] sm:$0xff]  ;;  %v62_v28 = vld [vmem:[%s664_s1] sm:$0xff] }
   0x6   :  { %37 = vadd.xlane.f32.xlu2 %v36_v8  ;;  %v472_v20 = vld [vmem:[%s663_s0 + $0x30] sm:$0xff]  ;;  %v477_v21 = vld [vmem:[%s663_s0 + $0x38] sm:$0xff]  ;;  %v51_v22 = vadd.f32 %v467_v19, %v462_v18  ;;  %v63_v30 = vld [vmem:[%s664_s1 + $0x8] sm:$0xff] }
   0x7   :  { %v39_v23 = vadd.f32 %v477_v21, %v472_v20  ;;  %v64_v36 = vld [vmem:[%s664_s1 + $0x10] sm:$0xff]  ;;  %v65_v50 = vld [vmem:[%s664_s1 + $0x18] sm:$0xff] }
   0xc   :  { %46 = vadd.xlane.f32.xlu1 %v45_v15 }
   0xd   :  { %34 = vadd.xlane.f32.xlu0 %v33_v16 }
   0xe   :  { %49 = vadd.xlane.f32.xlu2 %v48_v17 }
  0x14   :  { %52 = vadd.xlane.f32.xlu1 %v51_v22 }
  0x15   :  { %40 = vadd.xlane.f32.xlu0 %v39_v23 }
  0x77   :  { %v44_v24 = vpop.xlane.xlu1 %43 }
  0x78   :  { %v32_v25 = vpop.xlane.xlu0 %31  ;;  %v58_v27 = vmul.f32 0.00390625, %v44_v24 }
  0x79   :  { %v38_v26 = vpop.xlane.xlu2 %37  ;;  %v54_v29 = vmul.f32 0.00390625, %v32_v25 }
  0x7a   :  { %v70_v32 = vmul.f32 %v62_v28, %v58_v27  ;;  %v56_v37 = vmul.f32 0.00390625, %v38_v26 }
  0x7b   :  { %v66_v41 = vmul.f32 %v62_v28, %v54_v29  ;;  %v105_v29 = vld [vmem:[%s665_s2 + $0x10] sm:$0xff] }
  0x7c   :  { %v88_v43 = vsel %vm74_vm0, %v70_v32, 0.0  ;;  %v68_v46 = vmul.f32 %v64_v36, %v56_v37 }
  0x7d   :  { %v75_v48 = vsel %vm74_vm0, %v66_v41, 0.0  ;;  %v106_v41 = vld [vmem:[%s665_s2 + $0x18] sm:$0xff] }
  0x7e   :  { %v78_v56 = vsel %vm74_vm0, %v68_v46, 0.0 }
  0x7f   :  { %v47_v31 = vpop.xlane.xlu1 %46 }
  0x80   :  { %v59_v33 = vmul.f32 0.00390625, %v47_v31  ;;  %v35_v34 = vpop.xlane.xlu0 %34  ;;  %v103_v31 = vld [vmem:[%s665_s2] sm:$0xff] }
  0x81   :  { %v50_v35 = vpop.xlane.xlu2 %49  ;;  %v55_v38 = vmul.f32 0.00390625, %v35_v34 }
  0x82   :  { %v60_v39 = vmul.f32 0.00390625, %v50_v35  ;;  %v71_v40 = vmul.f32 %v63_v30, %v59_v33 }
  0x83   :  { %v67_v42 = vmul.f32 %v63_v30, %v55_v38  ;;  %v104_v30 = vld [vmem:[%s665_s2 + $0x8] sm:$0xff] }
  0x84   :  { %v89_v44 = vsel %vm74_vm0, %v71_v40, 0.0  ;;  %v72_v45 = vmul.f32 %v64_v36, %v60_v39 }
  0x85   :  { %v76_v47 = vsel %vm74_vm0, %v67_v42, 0.0  ;;  %v90_v49 = vadd.f32 %v89_v44, %v88_v43 }
  0x86   :  { %v77_v52 = vadd.f32 %v76_v47, %v75_v48  ;;  %v91_v53 = vsel %vm74_vm0, %v72_v45, 0.0 }
  0x87   :  { %v53_v51 = vpop.xlane.xlu1 %52  ;;  %v92_v59 = vadd.f32 %v91_v53, %v90_v49 }
  0x88   :  { %v61_v54 = vmul.f32 0.00390625, %v53_v51  ;;  %v41_v55 = vpop.xlane.xlu0 %40  ;;  %v79_v62 = vadd.f32 %v78_v56, %v77_v52 }
  0x89   :  { %v57_v57 = vmul.f32 0.00390625, %v41_v55 }
  0x8a   :  { %v73_v58 = vmul.f32 %v65_v50, %v61_v54 }
  0x8b   :  { %v69_v60 = vmul.f32 %v65_v50, %v57_v57 }
  0x8c   :  { %v93_v61 = vsel %vm74_vm0, %v73_v58, 0.0 }
  0x8d   :  { %v94_v63 = vadd.f32 %v93_v61, %v92_v59  ;;  %v80_v3 = vsel %vm74_vm0, %v69_v60, 0.0 }
  0x8e   :  { %v81_v7 = vadd.f32 %v80_v3, %v79_v62 }
  0x8f   :  { %v95_v8 = vrot.slane %v94_v63, 4 }
  0x90   :  { %v82_v15 = vrot.slane %v81_v7, 4 }
  0x91   :  { %v96_v16 = vadd.f32 %v95_v8, %v94_v63 }
  0x92   :  { %v83_v17 = vadd.f32 %v82_v15, %v81_v7 }
  0x93   :  { %v97_v22 = vrot.slane %v96_v16, 2 }
  0x94   :  { %v84_v23 = vrot.slane %v83_v17, 2 }
  0x95   :  { %v98_v24 = vadd.f32 %v97_v22, %v96_v16 }
  0x96   :  { %v85_v25 = vadd.f32 %v84_v23, %v83_v17 }
  0x97   :  { %v99_v26 = vrot.slane %v98_v24, 1 }
  0x98   :  { %v86_v27 = vrot.slane %v85_v25, 1 }
  0x99   :  { %v100_v33 = vadd.f32 %v99_v26, %v98_v24 }
  0x9a   :  { %v87_v28 = vadd.f32 %v86_v27, %v85_v25 }
  0x9b   :  { %v102_v40 = vmax.f32 %v100_v33, 0.0 }
  0x9c   :  { %v101_v32 = vmax.f32 %v87_v28, 0.0 }
  0x9d   :  { %v112_v42 = vmul.f32 %v104_v30, %v102_v40  ;;  %v111_v43 = vmul.f32 %v103_v31, %v102_v40  ;;  %v114_v48 = vmul.f32 %v106_v41, %v102_v40  ;;  %v113_v49 = vmul.f32 %v105_v29, %v102_v40 }
  0x9e   :  { %v109_v34 = vmul.f32 %v105_v29, %v101_v32  ;;  %v108_v35 = vmul.f32 %v104_v30, %v101_v32  ;;  %v107_v36 = vmul.f32 %v103_v31, %v101_v32  ;;  %v110_v44 = vmul.f32 %v106_v41, %v101_v32 }
  0x9f   :  { %v130_v45 = vsel %vm74_vm0, %v112_v42, 0.0  ;;  %v127_v46 = vsel %vm74_vm0, %v111_v43, 0.0  ;;  %v136_v50 = vsel %vm74_vm0, %v114_v48, 0.0  ;;  %v133_v51 = vsel %vm74_vm0, %v113_v49, 0.0 }
  0xa0   :  { %v121_v37 = vsel %vm74_vm0, %v109_v34, 0.0  ;;  %v118_v38 = vsel %vm74_vm0, %v108_v35, 0.0  ;;  %v115_v39 = vsel %vm74_vm0, %v107_v36, 0.0  ;;  %v124_v47 = vsel %vm74_vm0, %v110_v44, 0.0 }
  0xa1   :  { %122 = vadd.xlane.f32.xlu1 %v121_v37  ;;  %119 = vadd.xlane.f32.xlu0 %v118_v38 }
  0xa2   :  { %116 = vadd.xlane.f32.xlu2 %v115_v39 }
  0xa9   :  { %131 = vadd.xlane.f32.xlu1 %v130_v45  ;;  %128 = vadd.xlane.f32.xlu0 %v127_v46 }
  0xaa   :  { %125 = vadd.xlane.f32.xlu2 %v124_v47 }
  0xb1   :  { %137 = vadd.xlane.f32.xlu0 %v136_v50 }
  0xb2   :  { %134 = vadd.xlane.f32.xlu2 %v133_v51 }
 0x114   :  { %v123_v52 = vpop.xlane.xlu1 %122  ;;  %v120_v53 = vpop.xlane.xlu0 %119 }
 0x115   :  { %v329_v54 = vmul.f32 -1.442695, %v123_v52  ;;  %v328_v55 = vmul.f32 -1.442695, %v120_v53  ;;  %v117_v56 = vpop.xlane.xlu2 %116 }
 0x116   :  { %v327_v57 = vmul.f32 -1.442695, %v117_v56 }
 0x117   :  { %335 = vpow2.f32 %v329_v54 }
 0x118   :  { %337 = vpow2.f32 %v328_v55 }
 0x119   :  { %339 = vpow2.f32 %v327_v57 }
 0x11c   :  { %v132_v58 = vpop.xlane.xlu1 %131  ;;  %v129_v59 = vpop.xlane.xlu0 %128 }
 0x11d   :  { %v336_v60 = vpop.eup %335  ;;  %v332_v61 = vmul.f32 -1.442695, %v132_v58  ;;  %v126_v62 = vpop.xlane.xlu2 %125  ;;  %v331_v7 = vmul.f32 -1.442695, %v129_v59 }
 0x11e   :  { %v338_v63 = vpop.eup %337  ;;  %v165_v3 = vadd.f32 1.0, %v336_v60  ;;  %v330_v16 = vmul.f32 -1.442695, %v126_v62 }
 0x11f   :  { %v340_v8 = vpop.eup %339  ;;  %v164_v15 = vadd.f32 1.0, %v338_v63  ;;  %341 = vpow2.f32 %v332_v61 }
 0x120   :  { %343 = vrcp.f32 %v165_v3  ;;  %v523_v17 = vadd.f32 1.0, %v340_v8  ;;  %v210_v22 = vand.u32 2147483647, %v165_v3  ;;  %v212_v23 = vand.u32 2147483648, %v165_v3 }
 0x121   :  { %345 = vrcp.f32 %v164_v15  ;;  %v195_v26 = vand.u32 2147483647, %v164_v15  ;;  %v197_v29 = vand.u32 2147483648, %v164_v15  ;;  %vm206_vm1 = vweird.f32 %v165_v3 }
 0x122   :  { %347 = vpow2.f32 %v331_v7  ;;  %vm191_vm2 = vweird.f32 %v164_v15  ;;  %vm528_vm3 = vcmp.eq.f32.partialorder %v210_v22, 8.507059e+37  ;;  %v213_v37 = vor.u32 1.1754944e-38, %v212_v23 }
 0x123   :  { %349 = vpow2.f32 %v330_v16  ;;  %vm533_vm4 = vcmp.eq.f32.partialorder %v195_v26, 8.507059e+37  ;;  %v180_v42 = vand.u32 2147483647, %v523_v17  ;;  %v198_v46 = vor.u32 1.1754944e-38, %v197_v29 }
 0x124   :  { %351 = vrcp.f32 %v523_v17  ;;  %v138_v24 = vpop.xlane.xlu0 %137  ;;  %v182_v51 = vand.u32 2147483648, %v523_v17  ;;  %vm176_vm7 = vweird.f32 %v523_v17 }
 0x125   :  { %v342_v25 = vpop.eup %341  ;;  %v135_v27 = vpop.xlane.xlu2 %134  ;;  %v334_v31 = vmul.f32 -1.442695, %v138_v24  ;;  %vm546_vm8 = vcmp.eq.f32.partialorder %v180_v42, 8.507059e+37 }
 0x126   :  { %v344_v28 = vpop.eup %343  ;;  %v526_v30 = vadd.f32 1.0, %v342_v25  ;;  %v333_v34 = vmul.f32 -1.442695, %v135_v27  ;;  %v183_v7 = vor.u32 1.1754944e-38, %v182_v51 }
 0x127   :  { %v346_v32 = vpop.eup %345  ;;  %v202_v33 = vmul.f32 %v344_v28, %v165_v3  ;;  %vm207_vm5 = vweird.f32 %v344_v28 }
 0x128   :  { %v348_v35 = vpop.eup %347  ;;  %v187_v38 = vmul.f32 %v346_v32, %v164_v15  ;;  %353 = vrcp.f32 %v526_v30  ;;  %vm192_vm6 = vweird.f32 %v346_v32  ;;  %vm208_vm9 = vmor %vm206_vm1, %vm207_vm5  ;;  %v255_v57 = vand.u32 2147483647, %v526_v30 }
 0x129   :  { %v350_v39 = vpop.eup %349  ;;  %v203_v40 = vsub.f32 1.0, %v202_v33  ;;  %v538_v43 = vadd.f32 1.0, %v348_v35  ;;  %355 = vpow2.f32 %v334_v31  ;;  %v257_v58 = vand.u32 2147483648, %v526_v30  ;;  %vm193_vm10 = vmor %vm191_vm2, %vm192_vm6 }
 0x12a   :  { %v352_v44 = vpop.eup %351  ;;  %v188_v45 = vsub.f32 1.0, %v187_v38  ;;  %v540_v47 = vadd.f32 1.0, %v350_v39  ;;  %357 = vpow2.f32 %v333_v34  ;;  %vm251_vm12 = vweird.f32 %v526_v30 }
 0x12b   :  { %v204_v48 = vmul.f32 %v344_v28, %v203_v40  ;;  %v172_v49 = vmul.f32 %v352_v44, %v523_v17  ;;  %359 = vrcp.f32 %v538_v43  ;;  %vm177_vm11 = vweird.f32 %v352_v44 }
 0x12c   :  { %v189_v50 = vmul.f32 %v346_v32, %v188_v45  ;;  %361 = vrcp.f32 %v540_v47  ;;  %vm178_vm13 = vmor %vm176_vm7, %vm177_vm11  ;;  %vm568_vm14 = vcmp.eq.f32.partialorder %v255_v57, 8.507059e+37  ;;  %vm236_vm0 = vweird.f32 %v538_v43 }
 0x12d   :  { %v205_v52 = vadd.f32 %v344_v28, %v204_v48  ;;  %v173_v53 = vsub.f32 1.0, %v172_v49  ;;  %v242_v38 = vand.u32 2147483648, %v538_v43  ;;  %v225_v41 = vand.u32 2147483647, %v540_v47 }
 0x12e   :  { %v354_v55 = vpop.eup %353  ;;  %v190_v56 = vadd.f32 %v346_v32, %v189_v50  ;;  %v227_v42 = vand.u32 2147483648, %v540_v47  ;;  %vm221_vm6 = vweird.f32 %v540_v47 }
 0x12f   :  { %v209_v59 = vsel %vm208_vm9, %v344_v28, %v205_v52  ;;  %v174_v60 = vmul.f32 %v352_v44, %v173_v53  ;;  %v247_v61 = vmul.f32 %v354_v55, %v526_v30  ;;  %v356_v62 = vpop.eup %355  ;;  %vm252_vm15 = vweird.f32 %v354_v55 }
 0x130   :  { %v214_v63 = vsel %vm528_vm3, %v213_v37, %v209_v59  ;;  %v194_v3 = vsel %vm193_vm10, %v346_v32, %v190_v56  ;;  %v358_v8 = vpop.eup %357  ;;  %v581_v31 = vadd.f32 1.0, %v356_v62  ;;  %vm253_vm1 = vmor %vm251_vm12, %vm252_vm15  ;;  %v243_v49 = vor.u32 1.1754944e-38, %v242_v38 }
 0x131   :  { %v295_v16 = vmul.f32 %v214_v63, %v412_v5  ;;  %v296_v22 = vmul.f32 %v214_v63, %v417_v6  ;;  %v199_v15 = vsel %vm533_vm4, %v198_v46, %v194_v3  ;;  %v175_v23 = vadd.f32 %v352_v44, %v174_v60  ;;  %v360_v24 = vpop.eup %359 }
 0x132   :  { %v293_v25 = vmul.f32 %v199_v15, %v436_v11  ;;  %v294_v26 = vmul.f32 %v199_v15, %v441_v12  ;;  %v248_v27 = vsub.f32 1.0, %v247_v61  ;;  %v258_v6 = vor.u32 1.1754944e-38, %v257_v58  ;;  %v362_v29 = vpop.eup %361 }
 0x133   :  { %311 = vst [vmem:[%s666_s3 + $0x20] sm:$0xff] %v295_v16  ;;  %v179_v5 = vsel %vm178_vm13, %v352_v44, %v175_v23  ;;  %v232_v11 = vmul.f32 %v360_v24, %v538_v43  ;;  %v583_v32 = vadd.f32 1.0, %v358_v8  ;;  %v217_v36 = vmul.f32 %v362_v29, %v540_v47 }
 0x134   :  { %312 = vst [vmem:[%s666_s3 + $0x28] sm:$0xff] %v296_v22  ;;  %v184_v12 = vsel %vm546_vm8, %v183_v7, %v179_v5  ;;  %v249_v17 = vmul.f32 %v354_v55, %v248_v27  ;;  %363 = vrcp.f32 %v581_v31  ;;  %vm237_vm2 = vweird.f32 %v360_v24 }
 0x135   :  { %309 = vst [vmem:[%s666_s3 + $0x10] sm:$0xff] %v293_v25  ;;  %v291_v33 = vmul.f32 %v184_v12, %v400_v2  ;;  %v292_v34 = vmul.f32 %v184_v12, %v407_v4  ;;  %v233_v35 = vsub.f32 1.0, %v232_v11  ;;  %v240_v4 = vand.u32 2147483647, %v538_v43  ;;  %vm238_vm4 = vmor %vm236_vm0, %vm237_vm2 }
 0x136   :  { %310 = vst [vmem:[%s666_s3 + $0x18] sm:$0xff] %v294_v26  ;;  %v250_v37 = vadd.f32 %v354_v55, %v249_v17  ;;  %v218_v39 = vsub.f32 1.0, %v217_v36  ;;  %365 = vrcp.f32 %v583_v32  ;;  %vm222_vm3 = vweird.f32 %v362_v29 }
 0x137   :  { %307 = vst [vmem:[%s666_s3] sm:$0xff] %v291_v33  ;;  %v234_v2 = vmul.f32 %v360_v24, %v233_v35  ;;  %vm241_vm5 = vcmp.eq.f32.partialorder %v240_v4, 8.507059e+37  ;;  %vm223_vm7 = vmor %vm221_vm6, %vm222_vm3  ;;  %vm226_vm8 = vcmp.eq.f32.partialorder %v225_v41, 8.507059e+37  ;;  %v285_v61 = vand.u32 2147483647, %v581_v31 }
 0x138   :  { %308 = vst [vmem:[%s666_s3 + $0x8] sm:$0xff] %v292_v34  ;;  %v254_v40 = vsel %vm253_vm1, %v354_v55, %v250_v37  ;;  %v219_v45 = vmul.f32 %v362_v29, %v218_v39  ;;  %vm281_vm10 = vweird.f32 %v581_v31  ;;  %v270_v3 = vand.u32 2147483647, %v583_v32 }
 0x139   :  { %v259_v30 = vsel %vm568_vm14, %v258_v6, %v254_v40  ;;  %v235_v44 = vadd.f32 %v360_v24, %v234_v2  ;;  %vm286_vm13 = vcmp.eq.f32.partialorder %v285_v61, 8.507059e+37  ;;  %vm266_vm14 = vweird.f32 %v583_v32 }
 0x13a   :  { %v301_v46 = vmul.f32 %v259_v30, %v426_v9  ;;  %v302_v48 = vmul.f32 %v259_v30, %v431_v10  ;;  %v220_v51 = vadd.f32 %v362_v29, %v219_v45  ;;  %v364_v52 = vpop.eup %363  ;;  %v228_v9 = vor.u32 1.1754944e-38, %v227_v42 }
 0x13b   :  { %v239_v50 = vsel %vm238_vm4, %v360_v24, %v235_v44  ;;  %v277_v47 = vmul.f32 %v364_v52, %v581_v31  ;;  %vm282_vm9 = vweird.f32 %v364_v52  ;;  %vm271_vm0 = vcmp.eq.f32.partialorder %v270_v3, 8.507059e+37 }
 0x13c   :  { %317 = vst [vmem:[%s666_s3 + $0x50] sm:$0xff] %v301_v46  ;;  %v244_v53 = vsel %vm241_vm5, %v243_v49, %v239_v50  ;;  %v224_v54 = vsel %vm223_vm7, %v362_v29, %v220_v51  ;;  %v366_v55 = vpop.eup %365  ;;  %vm283_vm12 = vmor %vm281_vm10, %vm282_vm9 }
 0x13d   :  { %318 = vst [vmem:[%s666_s3 + $0x58] sm:$0xff] %v302_v48  ;;  %v299_v10 = vmul.f32 %v244_v53, %v390_v0  ;;  %v300_v43 = vmul.f32 %v244_v53, %v395_v1  ;;  %v229_v56 = vsel %vm226_vm8, %v228_v9, %v224_v54  ;;  %v278_v59 = vsub.f32 1.0, %v277_v47 }
 0x13e   :  { %v297_v57 = vmul.f32 %v229_v56, %v472_v20  ;;  %v298_v58 = vmul.f32 %v229_v56, %v477_v21  ;;  %v262_v60 = vmul.f32 %v366_v55, %v583_v32  ;;  %v287_v0 = vand.u32 2147483648, %v581_v31 }
 0x13f   :  { %315 = vst [vmem:[%s666_s3 + $0x40] sm:$0xff] %v299_v10  ;;  %v279_v1 = vmul.f32 %v364_v52, %v278_v59  ;;  %v272_v21 = vand.u32 2147483648, %v583_v32  ;;  %vm267_vm11 = vweird.f32 %v366_v55 }
 0x140   :  { %316 = vst [vmem:[%s666_s3 + $0x48] sm:$0xff] %v300_v43  ;;  %v263_v20 = vsub.f32 1.0, %v262_v60  ;;  %v288_v7 = vor.u32 1.1754944e-38, %v287_v0  ;;  %vm268_vm15 = vmor %vm266_vm14, %vm267_vm11 }
 0x141   :  { %313 = vst [vmem:[%s666_s3 + $0x30] sm:$0xff] %v297_v57  ;;  %v280_v62 = vadd.f32 %v364_v52, %v279_v1  ;;  %v273_v15 = vor.u32 1.1754944e-38, %v272_v21 }
 0x142   :  { %314 = vst [vmem:[%s666_s3 + $0x38] sm:$0xff] %v298_v58  ;;  %v264_v63 = vmul.f32 %v366_v55, %v263_v20 }
 0x143   :  { %v284_v8 = vsel %vm283_vm12, %v364_v52, %v280_v62 }
 0x144   :  { %v265_v16 = vadd.f32 %v366_v55, %v264_v63  ;;  %v289_v22 = vsel %vm286_vm13, %v288_v7, %v284_v8 }
 0x145   :  { %v305_v23 = vmul.f32 %v289_v22, %v462_v18  ;;  %v306_v24 = vmul.f32 %v289_v22, %v467_v19 }
 0x146   :  { %v269_v25 = vsel %vm268_vm15, %v366_v55, %v265_v16 }
 0x147   :  { %v274_v26 = vsel %vm271_vm0, %v273_v15, %v269_v25  ;;  %321 = vst [vmem:[%s666_s3 + $0x70] sm:$0xff] %v305_v23 }
 0x148   :  { %v303_v27 = vmul.f32 %v274_v26, %v446_v13  ;;  %v304_v28 = vmul.f32 %v274_v26, %v451_v14  ;;  %322 = vst [vmem:[%s666_s3 + $0x78] sm:$0xff] %v306_v24 }
 0x14a   :  { %319 = vst [vmem:[%s666_s3 + $0x60] sm:$0xff] %v303_v27 }
 0x14b   :  { %320 = vst [vmem:[%s666_s3 + $0x68] sm:$0xff] %v304_v28 }

</bundles_post_ra>
